<compile_context>
chip_gen: v7x
topology: tpu7x:2x2x1
jax: 0.10.0
libtpu: 0.0.40
codegen_flags: <defaults>
</compile_context>

<pallas_src>
import math
import jax
import jax.numpy as jnp
from jax.experimental import pallas as pl
from jax.experimental.pallas import tpu as pltpu

# ---- module "hyper-parameters" (from __init__ defaults) ----------------------
RADIUS = 1e-05
COUPLING_STRENGTH = 0.3
Q_FACTOR = 10000.0
CENTER_WAVELENGTH = 1.55e-06
THERMAL_COEFFICIENT = 8.6e-05
N_GROUP = 4.2
CIRCUMFERENCE = 2.0 * math.pi * RADIUS
FSR = CENTER_WAVELENGTH ** 2 / (N_GROUP * CIRCUMFERENCE)

KERR_COEFF = 2.7e-18
ALPHA_VAL = 1.0 - math.pi / Q_FACTOR          # round-trip loss factor
TWO_PI_OVER_FSR = 2.0 * math.pi / FSR


# ---------------------------------------------------------------------------
# Kernel 1: ring transfer function, (1, Wp), wavelength-only.  Runs once.
# ---------------------------------------------------------------------------
def _transmission_kernel(phase_ref, coup_ref, wl_ref, tthru_ref, tdrop_ref):
    wl = wl_ref[...]                          # (1, Wp) f32
    phase = phase_ref[0]                      # phase_shift + 0.1 * kerr_phase
    kappa = jnp.clip(coup_ref[0], 0.1, 0.9)
    t = jnp.sqrt(1.0 - kappa * kappa)
    alpha = jnp.float32(ALPHA_VAL)
    at = alpha * t

    delta_lambda = wl - jnp.float32(CENTER_WAVELENGTH)
    total_phase = jnp.float32(TWO_PI_OVER_FSR) * delta_lambda + phase

    # Single transcendental (half-angle sine), shared term reused for num/den.
    s_half = jnp.sin(0.5 * total_phase)
    shared = (4.0 * at) * (s_half * s_half)
    num = (t - alpha) ** 2 + shared           # |t - a e^{ip}|^2
    den = (1.0 - at) ** 2 + shared            # |1 - a t e^{ip}|^2

    # Divide on the EUP: approximate reciprocal + one Newton step.
    inv_den = pl.reciprocal(den, approx=True)
    inv_den = inv_den * (2.0 - den * inv_den)

    tthru_ref[...] = num * inv_den
    tdrop_ref[...] = (kappa * kappa * alpha) * inv_den


# ---------------------------------------------------------------------------
# Kernel 2: batch-tiled broadcast multiply (pure HBM-bandwidth path).
# ---------------------------------------------------------------------------
def _apply_kernel(tthru_ref, tdrop_ref, x_ref, thru_out_ref, drop_out_ref):
    x = x_ref[...]                            # (TB, Wp)
    thru_out_ref[...] = x * tthru_ref[...]    # (TB, Wp) * (1, Wp)
    drop_out_ref[...] = x * tdrop_ref[...]


def _round_up(n, m):
    return ((n + m - 1) // m) * m


def microring_forward(input_signal, wavelengths, phase_shift, coupling_tuning):
    """input_signal: (B, W) f32, wavelengths: (W,) f32, params: (1,) f32 each."""
    x = input_signal.astype(jnp.float32)
    wl = wavelengths.astype(jnp.float32)
    B, W = x.shape

    # ---- Kerr phase from global mean input power (hoisted scalar reduction) --
    mean_power = jnp.mean(x * x)
    kerr_phase = jnp.float32(KERR_COEFF) * mean_power
    phase_total = (phase_shift.astype(jnp.float32).reshape(-1)[:1]
                   + kerr_phase * jnp.float32(0.1))          # (1,)
    coup = coupling_tuning.astype(jnp.float32).reshape(-1)[:1]

    # ---- lane padding: keep last dim a multiple of 128 (unmasked stores) -----
    Wp = max(_round_up(W, 128), 128)
    if Wp != W:
        x = jnp.pad(x, ((0, 0), (0, Wp - W)))
        wl = jnp.pad(wl, (0, Wp - W))
    wl2d = wl.reshape(1, Wp)

    smem = pl.BlockSpec(memory_space=pltpu.MemorySpace.SMEM)
    vmem = pl.BlockSpec(memory_space=pltpu.MemorySpace.VMEM)

    # ---- 1) transmission spectra (computed exactly once) ---------------------
    tthru, tdrop = pl.pallas_call(
        _transmission_kernel,
        out_shape=(jax.ShapeDtypeStruct((1, Wp), jnp.float32),
                   jax.ShapeDtypeStruct((1, Wp), jnp.float32)),
        in_specs=[smem, smem, vmem],
        out_specs=(vmem, vmem),
    )(phase_total, coup, wl2d)

    # ---- 2) batch-tiled broadcast multiply ------------------------------------
    # Row tile: multiple of 8, <= 1024 rows, and small enough that the three
    # double-buffered (TB, Wp) f32 arrays (x, through, drop) stay well inside
    # the default scoped VMEM on every generation (v5e/v6e/v7x).
    vmem_budget = 12 * 1024 * 1024                      # bytes for pipelined tiles
    tb_cap = max(8, (vmem_budget // (6 * 4 * Wp)) // 8 * 8)
    TB = min(_round_up(B, 8), 1024, tb_cap)
    Bp = _round_up(B, TB)
    if Bp != B:
        x = jnp.pad(x, ((0, Bp - B), (0, 0)))

    through, drop = pl.pallas_call(
        _apply_kernel,
        out_shape=(jax.ShapeDtypeStruct((Bp, Wp), jnp.float32),
                   jax.ShapeDtypeStruct((Bp, Wp), jnp.float32)),
        grid=(Bp // TB,),
        in_specs=[pl.BlockSpec((1, Wp), lambda i: (0, 0)),
                  pl.BlockSpec((1, Wp), lambda i: (0, 0)),
                  pl.BlockSpec((TB, Wp), lambda i: (i, 0))],
        out_specs=(pl.BlockSpec((TB, Wp), lambda i: (i, 0)),
                   pl.BlockSpec((TB, Wp), lambda i: (i, 0))),
        compiler_params=pltpu.CompilerParams(
            dimension_semantics=("parallel",)),     # megacore-shard batch (v7x)
    )(tthru, tdrop, x)

    return {
        "through": through[:B, :W],
        "drop": drop[:B, :W],
        "transmission_through": tthru[0, :W],
        "transmission_drop": tdrop[0, :W],
    }


# ---------------------------------------------------------------------------
# Pure-JAX reference mirroring the PyTorch forward (real-valued input signal).
# ---------------------------------------------------------------------------
def _reference(input_signal, wavelengths, phase_shift, coupling_tuning):
    power = input_signal ** 2
    mean_power = jnp.mean(power)
    kerr_phase = KERR_COEFF * mean_power
    new_phase = phase_shift[0] + kerr_phase * 0.1
    delta_lambda = wavelengths - CENTER_WAVELENGTH
    detuning = 2.0 * jnp.pi * delta_lambda / FSR
    total_phase = detuning + new_phase
    kappa = jnp.clip(coupling_tuning[0], 0.1, 0.9)
    t = jnp.sqrt(1.0 - kappa ** 2)
    alpha = jnp.float32(ALPHA_VAL)
    e = jnp.exp(1j * total_phase.astype(jnp.complex64))
    denom = 1.0 - alpha * t * e
    thru = jnp.abs((t - alpha * e) / denom) ** 2
    drop = jnp.abs(kappa * jnp.sqrt(alpha) / denom) ** 2
    return input_signal * thru[None, :], input_signal * drop[None, :], thru, drop


if __name__ == "__main__":
    key = jax.random.PRNGKey(0)
    k1, _ = jax.random.split(key)

    B, W = 8, 128
    input_signal = jax.random.normal(k1, (B, W), dtype=jnp.float32)
    # wavelength sweep of +/- 2 nm around the ring center wavelength
    wavelengths = (CENTER_WAVELENGTH +
                   jnp.linspace(-2e-9, 2e-9, W, dtype=jnp.float32))

    # deterministic parameter init matching nn.Parameter defaults in __init__
    phase_shift = jnp.zeros((1,), dtype=jnp.float32)
    coupling_tuning = jnp.array([COUPLING_STRENGTH], dtype=jnp.float32)

    out = microring_forward(input_signal, wavelengths, phase_shift, coupling_tuning)
    jax.block_until_ready(out)

    ref_thru, ref_drop, ref_tt, ref_td = _reference(
        input_signal, wavelengths, phase_shift, coupling_tuning)
    assert jnp.allclose(out["through"], ref_thru, atol=1e-5, rtol=2e-5)
    assert jnp.allclose(out["drop"], ref_drop, atol=1e-5, rtol=2e-5)
    assert jnp.allclose(out["transmission_through"], ref_tt, atol=1e-5, rtol=2e-5)
    assert jnp.allclose(out["transmission_drop"], ref_td, atol=1e-5, rtol=2e-5)

    print("KERNEL_OK")
</pallas_src>

<mosaic_0001>
module attributes {stable_mosaic.version = 11 : i64} {
  func.func @_transmission_kernel(%arg0: memref<1xf32, #tpu.memory_space<smem>>, %arg1: memref<1xf32, #tpu.memory_space<smem>>, %arg2: memref<1x128xf32, #tpu.memory_space<vmem>>, %arg3: memref<1x128xf32, #tpu.memory_space<vmem>>, %arg4: memref<1x128xf32, #tpu.memory_space<vmem>>) attributes {dimension_semantics = [], scalar_prefetch = 0 : i64, scratch_operands = 0 : i64, tpu.core_type = #tpu.core_type<tc>} {
    %c0 = arith.constant 0 : index
    %c0_0 = arith.constant 0 : index
    %0 = vector.load %arg2[%c0, %c0_0] : memref<1x128xf32, #tpu.memory_space<vmem>>, vector<1x128xf32>
    %c0_1 = arith.constant 0 : index
    %1 = memref.load %arg0[%c0_1] : memref<1xf32, #tpu.memory_space<smem>>
    %c0_2 = arith.constant 0 : index
    %2 = memref.load %arg1[%c0_2] : memref<1xf32, #tpu.memory_space<smem>>
    %cst = arith.constant 1.000000e-01 : f32
    %cst_3 = arith.constant 0.899999976 : f32
    %3 = arith.maximumf %cst, %2 : f32
    %4 = arith.minimumf %cst_3, %3 : f32
    %5 = arith.mulf %4, %4 : f32
    %cst_4 = arith.constant 1.000000e+00 : f32
    %6 = arith.subf %cst_4, %5 : f32
    %7 = math.sqrt %6 : f32
    %cst_5 = arith.constant 0.999685823 : f32
    %8 = arith.mulf %cst_5, %7 : f32
    %cst_6 = arith.constant 1.550000e-06 : f32
    %9 = vector.broadcast %cst_6 : f32 to vector<1x128xf32>
    %10 = arith.subf %0, %9 : vector<1x128xf32>
    %cst_7 = arith.constant 0x4E248B9F : f32
    %11 = vector.broadcast %cst_7 : f32 to vector<1x128xf32>
    %12 = arith.mulf %11, %10 : vector<1x128xf32>
    %13 = vector.broadcast %1 : f32 to vector<1x128xf32>
    %14 = arith.addf %12, %13 : vector<1x128xf32>
    %cst_8 = arith.constant 5.000000e-01 : f32
    %15 = vector.broadcast %cst_8 : f32 to vector<1x128xf32>
    %16 = arith.mulf %15, %14 : vector<1x128xf32>
    %17 = math.sin %16 : vector<1x128xf32>
    %cst_9 = arith.constant 4.000000e+00 : f32
    %18 = arith.mulf %cst_9, %8 : f32
    %19 = arith.mulf %17, %17 : vector<1x128xf32>
    %20 = vector.broadcast %18 : f32 to vector<1x128xf32>
    %21 = arith.mulf %20, %19 : vector<1x128xf32>
    %cst_10 = arith.constant 0.999685823 : f32
    %22 = arith.subf %7, %cst_10 : f32
    %23 = arith.mulf %22, %22 : f32
    %24 = vector.broadcast %23 : f32 to vector<1x128xf32>
    %25 = arith.addf %24, %21 : vector<1x128xf32>
    %cst_11 = arith.constant 1.000000e+00 : f32
    %26 = arith.subf %cst_11, %8 : f32
    %27 = arith.mulf %26, %26 : f32
    %28 = vector.broadcast %27 : f32 to vector<1x128xf32>
    %29 = arith.addf %28, %21 : vector<1x128xf32>
    %30 = tpu.reciprocal %29 {approx = true} : vector<1x128xf32> -> vector<1x128xf32>
    %31 = arith.mulf %29, %30 : vector<1x128xf32>
    %cst_12 = arith.constant 2.000000e+00 : f32
    %32 = vector.broadcast %cst_12 : f32 to vector<1x128xf32>
    %33 = arith.subf %32, %31 : vector<1x128xf32>
    %34 = arith.mulf %30, %33 : vector<1x128xf32>
    %35 = arith.mulf %25, %34 : vector<1x128xf32>
    %c0_13 = arith.constant 0 : index
    %c0_14 = arith.constant 0 : index
    %36 = vector.load %arg3[%c0_13, %c0_14] : memref<1x128xf32, #tpu.memory_space<vmem>>, vector<1x128xf32>
    tpu.vector_store %arg3[%c0_13, %c0_14], %35 {strides = array<i32>} : memref<1x128xf32, #tpu.memory_space<vmem>>, vector<1x128xf32>,
    %37 = arith.mulf %4, %4 : f32
    %cst_15 = arith.constant 0.999685823 : f32
    %38 = arith.mulf %37, %cst_15 : f32
    %39 = vector.broadcast %38 : f32 to vector<1x128xf32>
    %40 = arith.mulf %39, %34 : vector<1x128xf32>
    %c0_16 = arith.constant 0 : index
    %c0_17 = arith.constant 0 : index
    %41 = vector.load %arg4[%c0_16, %c0_17] : memref<1x128xf32, #tpu.memory_space<vmem>>, vector<1x128xf32>
    tpu.vector_store %arg4[%c0_16, %c0_17], %40 {strides = array<i32>} : memref<1x128xf32, #tpu.memory_space<vmem>>, vector<1x128xf32>,
    return
  }
}

</mosaic_0001>

<bundles_post_ra>
// kernel: tpu_custom_call.1
= control target key start
LH: loop header
LB: loop body
LE: loop exit
PB: predicated region body
PF: predicated region fallthrough
CT: control target
= control target key end

     0   :  { %12 = vsyncpa [#allocation5], 0  ;;  %s274_s17 = smov 0.1   ;;  %s275_s21 = smov 0.9   ;;  %s378_s0 = inlined_call_operand.<no memory space> [shape: f32[1], index: 0, kind: input, shape index: {}]   ;;  %s379_s1 = inlined_call_operand.<no memory space> [shape: f32[1], index: 1, kind: input, shape index: {}]   ;;  %s380_s2 = inlined_call_operand.vmem [shape: f32[1,128], index: 2, kind: input, shape index: {}]   ;;  %s381_s3 = inlined_call_operand.hbm [shape: f32[1,128], index: 3, kind: output, shape index: {0}]   ;;  %s382_s4 = inlined_call_operand.hbm [shape: f32[1,128], index: 4, kind: output, shape index: {1}]  }
   0x1   :  { %v20_v0 = vld [vmem:[%s380_s2] sm:$0x1]  ;;  %s23_s20 = smax.f32 %s274_s17, %s379_s1  ;;  %v39_v2 = vstv %s378_s0 }
   0x2   :  { %v196_v1 = vadd.f32 -1.55e-06, %v20_v0  ;;  %s24_s22 = smin.f32 %s275_s21, %s23_s20 }
   0x3   :  { %s318_s25 = smul.f32 %s24_s22, %s24_s22 }
   0x4   :  { %v38_v3 = vmul.f32 6.901534e+08, %v196_v1 }
   0x5   :  { %13 = vsyncpa [#allocation7], 0  ;;  %s26_s26 = ssub.f32 1.0, %s318_s25  ;;  %v276_v22 = vmov 683565275   ;;  %s282_s6 = smov [#allocation4]  }
   0x6   :  { %v40_v4 = vadd.f32 %v39_v2, %v38_v3  ;;  %v277_v24 = vmov 2475754826   ;;  %v278_v27 = vmov 2131351028   ;;  %v279_v29 = vmov 2102212464  }
   0x7   :  { %v27_v5 = vstv %s26_s26  ;;  %v280_v31 = vmov 920167782   ;;  %v281_v38 = vmov 1326507024   ;;  %s164_s30 = smul.f32 0.9996858, %s318_s25 }
   0x8   :  { %v321_v6 = vmul.f32 0.5, %v40_v4  ;;  %218 = vrsqrt.f32 %v27_v5  ;;  %vm30_vm1 = vcmp.eq.f32.partialorder %v27_v5, inf  ;;  %v33_v14 = vand.u32 2147483648, %v27_v5  ;;  %s174_s7 = sshll.u32 %s282_s6, 4  ;;  %s283_s8 = smov [#allocation6]   ;;  %s175_s7 = int_to_ptr.vmem [resolvable:$true] %s174_s7 }
   0x9   :  { %vm32_vm2 = vcmp.eq.f32.partialorder %v27_v5, 0.0  ;;  %s184_s9 = sshll.u32 %s283_s8, 4  ;;  %s226_s10 = scalar_lea.vmem %s175_s7, 16  ;;  %s346_s9 = int_to_ptr.vmem [resolvable:$true] %s184_s9 }
   0xa   :  { %v45_v7 = vand.u32 2139095040, %v321_v6  ;;  %v42_v9 = vand.u32 2147483647, %v321_v6  ;;  %vm44_vm9 = vcmp.lt.s32.totalorder %v321_v6, 0  ;;  %vm134_vm14 = vweird.f32 %v321_v6  ;;  %p227_p0 = scmp.ne.s32.totalorder %s175_s7, %s226_s10  ;;  %s230_s11 = scalar_lea.vmem %s175_s7, 32 }
   0xb   :  { %p231_p1 = scmp.lt.s32.totalorder %s175_s7, %s175_s7  ;;  %p232_p2 = scmp.lt.s32.totalorder %s230_s11, %s226_s10 }
   0xc   :  { %v46_v8 = vshrl.u32 %v45_v7, 23  ;;  %v49_v12 = vand.u32 8388607, %v42_v9  ;;  %vm43_vm10 = vcmp.le.f32.partialorder %v42_v9, 0.7853982 }
   0xd   :  { %p233_p3 = por %p232_p2, %p231_p1 }
   0xe   :  { %v197_v10 = vadd.s32 4294967169, %v46_v8  ;;  %v50_v18 = vor.u32 8388608, %v49_v12 }
   0xf   :  { %p234_p4 = pnand %p233_p3, %p227_p0 }
  0x10   :  { %v52_v11 = vadd.s32 1, %v197_v10  ;;  %v90_v40 = vshll.u32 %v50_v18, 8 }
  0x12   :  { %vm53_vm0 = vcmp.gt.s32.totalorder %v52_v11, 0  ;;  %v219_v13 = vpop.eup %218 }
  0x13   :  { %v54_v15 = vsel %vm53_vm0, %v52_v11, 0  ;;  %v29_v16 = vmul.f32 %v219_v13, %v27_v5 }
  0x14   :  { %v56_v17 = vand.u32 31, %v54_v15  ;;  %v55_v19 = vshrl.u32 %v54_v15, 5 }
  0x15   :  { %v31_v20 = vsel %vm30_vm1, %v27_v5, %v29_v16 }
  0x16   :  { %v57_v21 = vsub.s32 32, %v56_v17  ;;  %v59_v23 = vshll.u32 %v276_v22, %v56_v17  ;;  %v62_v25 = vshll.u32 %v277_v24, %v56_v17  ;;  %v34_v26 = vsel %vm32_vm2, %v33_v14, %v31_v20 }
  0x17   :  { %v65_v28 = vshll.u32 %v278_v27, %v56_v17  ;;  %v68_v30 = vshll.u32 %v279_v29, %v56_v17  ;;  %v71_v32 = vshll.u32 %v280_v31, %v56_v17  ;;  %202 = vpush %v34_v26  ;;  %vm74_vm3 = vcmp.lt.s32.totalorder %v55_v19, 1 }
  0x18   :  { %v58_v33 = vshrl.u32 %v276_v22, %v57_v21  ;;  %v60_v34 = vshrl.u32 %v277_v24, %v57_v21  ;;  %v63_v35 = vshrl.u32 %v278_v27, %v57_v21  ;;  %v66_v36 = vshrl.u32 %v279_v29, %v57_v21 }
  0x19   :  { %v69_v37 = vshrl.u32 %v280_v31, %v57_v21  ;;  %v72_v39 = vshrl.u32 %v281_v38, %v57_v21  ;;  %vm75_vm4 = vcmp.lt.s32.totalorder %v55_v19, 2  ;;  %vm76_vm5 = vcmp.lt.s32.totalorder %v55_v19, 3 }
  0x1a   :  { %v61_v41 = vor.u32 %v60_v34, %v59_v23  ;;  %v64_v42 = vor.u32 %v63_v35, %v62_v25  ;;  %v67_v43 = vor.u32 %v66_v36, %v65_v28  ;;  %vm77_vm6 = vcmp.lt.s32.totalorder %v55_v19, 4 }
  0x1b   :  { %v70_v44 = vor.u32 %v69_v37, %v68_v30  ;;  %v73_v45 = vor.u32 %v72_v39, %v71_v32 }
  0x1c   :  { %v78_v46 = vsel %vm74_vm3, %v58_v33, %v61_v41  ;;  %v79_v47 = vsel %vm77_vm6, %v67_v43, 2102212464  ;;  %v82_v48 = vsel %vm74_vm3, %v61_v41, %v64_v42  ;;  %v86_v49 = vsel %vm74_vm3, %v64_v42, %v67_v43 }
  0x1d   :  { %v80_v50 = vsel %vm76_vm5, %v64_v42, %v79_v47  ;;  %v83_v51 = vsel %vm77_vm6, %v70_v44, 920167782  ;;  %v87_v52 = vsel %vm77_vm6, %v73_v45, 1326507024 }
  0x1e   :  { %v84_v53 = vsel %vm76_vm5, %v67_v43, %v83_v51  ;;  %v88_v54 = vsel %vm76_vm5, %v70_v44, %v87_v52  ;;  %v81_v55 = vsel %vm75_vm4, %v78_v46, %v80_v50 }
  0x1f   :  { %v85_v56 = vsel %vm75_vm4, %v82_v48, %v84_v53  ;;  %v89_v57 = vsel %vm75_vm4, %v86_v49, %v88_v54  ;;  %v97_v62 = vmul.u32 %v90_v40, %v81_v55 }
  0x20   :  { %v330_v58 = vmul.u32.u64.low %v90_v40, %v89_v57  ;;  %v331_v59 = vmul.u32.u64.high %v90_v40, %v89_v57, %v330_v58  ;;  %v333_v60 = vmul.u32.u64.low %v90_v40, %v85_v56  ;;  %v334_v61 = vmul.u32.u64.high %v90_v40, %v85_v56, %v333_v60 }
  0x22   :  { %vm99_vm7 = vc.u32 %v331_v59, %v333_v60  ;;  %v100_v63 = vadd.s32 1, %v334_v61  ;;  %v98_v12 = vadd.s32 %v333_v60, %v331_v59 }
  0x24   :  { %v101_v0 = vsel %vm99_vm7, %v100_v63, %v334_v61 }
  0x25   :  { %v102_v1 = vadd.s32 %v101_v0, %v97_v62 }
  0x27   :  { %v103_v2 = vadd.s32 536870912, %v102_v1 }
  0x29   :  { %v104_v3 = vshrl.u32 %v103_v2, 30 }
  0x2b   :  { %v105_v4 = vshll.u32 %v104_v3, 30  ;;  %v128_v24 = vsub.s32 4, %v104_v3 }
  0x2d   :  { %v106_v5 = vsub.s32 %v102_v1, %v105_v4  ;;  %v129_v27 = vsel %vm44_vm9, %v128_v24, %v104_v3 }
  0x2e   :  { %v131_v30 = vsel %vm43_vm10, 0, %v129_v27 }
  0x2f   :  { %v108_v7 = vsub.s32 0, %v106_v5  ;;  %v135_v31 = vadd.s32 3, %v131_v30 }
  0x31   :  { %v198_v8 = vmin.u32 %v108_v7, %v106_v5  ;;  %v136_v32 = vand.u32 3, %v135_v31 }
  0x33   :  { %v110_v10 = vclz %v198_v8  ;;  %vm141_vm11 = vcmp.eq.s32.totalorder %v136_v32, 2  ;;  %vm138_vm12 = vcmp.eq.s32.totalorder %v136_v32, 0  ;;  %vm137_vm13 = vcmp.lt.s32.totalorder %v136_v32, 2 }
  0x35   :  { %v199_v11 = vadd.s32 4294967294, %v110_v10 }
  0x37   :  { %vm200_vm8 = vcmp.lt.s32.totalorder %v199_v11, 0 }
  0x38   :  { %v113_v13 = vsel %vm200_vm8, 0, %v199_v11 }
  0x39   :  { %v114_v14 = vsub.s32 32, %v113_v13  ;;  %v115_v15 = vshll.u32 %v106_v5, %v113_v13  ;;  %v118_v16 = vsub.s32 4294967266, %v113_v13 }
  0x3b   :  { %v116_v17 = vshrl.u32 %v98_v12, %v114_v14  ;;  %v119_v18 = vadd.s32 127, %v118_v16 }
  0x3d   :  { %v117_v19 = vor.u32 %v116_v17, %v115_v15  ;;  %v120_v20 = vshll.u32 %v119_v18, 23 }
  0x3f   :  { %v121_v21 = vor.u32 4788187, %v120_v20  ;;  %v124_v22 = vcvt.s32.f32 %v117_v19 }
  0x41   :  { %v122_v23 = vand.u32 2147483647, %v121_v21 }
  0x43   :  { %v125_v25 = vmul.f32 %v124_v22, %v122_v23 }
  0x45   :  { %v126_v26 = vxor.u32 2147483648, %v125_v25 }
  0x47   :  { %v127_v28 = vsel %vm44_vm9, %v126_v26, %v125_v25 }
  0x48   :  { %v130_v29 = vsel %vm43_vm10, %v321_v6, %v127_v28  ;;  %s203_s0 = spop %202  ;;  %v165_v6 = vstv %s164_s30 }
  0x49   :  { %220 = vcosq.f32 %v130_v29  ;;  %s36_s1 = smul.f32 0.9996858, %s203_s0  ;;  %s201_s29 = sadd.f32 -0.9996858, %s203_s0 }
  0x4a   :  { %222 = vsinq.f32 %v130_v29 }
  0x4b   :  { %s154_s2 = ssub.f32 1.0, %s36_s1  ;;  %s146_s27 = smul.f32 4.0, %s36_s1 }
  0x4c   :  { %s151_s5 = smul.f32 %s201_s29, %s201_s29 }
  0x4d   :  { %s155_s28 = smul.f32 %s154_s2, %s154_s2  ;;  %v148_v40 = vstv %s146_s27 }
  0x4e   :  { %v152_v48 = vstv %s151_s5 }
  0x4f   :  { %v156_v42 = vstv %s155_s28 }
  0x53   :  { %v221_v33 = vpop.eup %220 }
  0x54   :  { %v223_v34 = vpop.eup %222  ;;  %v142_v35 = vxor.u32 2147483648, %v221_v33 }
  0x55   :  { %v139_v9 = vxor.u32 2147483648, %v223_v34 }
  0x56   :  { %v143_v36 = vsel %vm141_vm11, %v142_v35, %v223_v34 }
  0x57   :  { %v140_v37 = vsel %vm138_vm12, %v221_v33, %v139_v9 }
  0x58   :  { %v144_v38 = vsel %vm137_vm13, %v140_v37, %v143_v36 }
  0x59   :  { %v145_v39 = vsel %vm134_vm14, nan, %v144_v38 }
  0x5a   :  { %v147_v41 = vmul.f32 %v145_v39, %v145_v39 }
  0x5c   :  { %v149_v43 = vmul.f32 %v148_v40, %v147_v41 }
  0x5e   :  { %v157_v44 = vadd.f32 %v156_v42, %v149_v43  ;;  %v153_v49 = vadd.f32 %v152_v48, %v149_v43 }
  0x60   :  { %224 = vrcp.f32 %v157_v44 }
  0x6a   :  { %v225_v45 = vpop.eup %224 }
  0x6b   :  { %v159_v46 = vmul.f32 %v225_v45, %v157_v44 }
  0x6d   :  { %v160_v47 = vsub.f32 2.0, %v159_v46 }
  0x6f   :  { %v161_v50 = vmul.f32 %v225_v45, %v160_v47 }
  0x71   :  { %v162_v51 = vmul.f32 %v161_v50, %v153_v49  ;;  %v166_v52 = vmul.f32 %v165_v6, %v161_v50 }
  0x73   :  { %163 = vst [vmem:[#allocation4] sm:$0x1] %v162_v51  ;;  %167 = vst [vmem:[#allocation6] sm:$0x1] %v166_v52 }
  0x74   :  { %237 = shalt.err (!%p234_p4)
}
  0x75   :  { %s238_s14 = scalar_lea.hbm %s381_s3, 16 }
  0x76   :  { %p239_p5 = scmp.ne.s32.totalorder %s381_s3, %s238_s14  ;;  %p242_p6 = scmp.lt.u32.totalorder %s238_s14, %s381_s3 }
  0x78   :  { %p244_p7 = pnand %p242_p6, %p239_p5 }
  0x7a   :  { %247 = shalt.err (!%p244_p7)
}
  0x7b   :  { %177 = dma.vmem_to_hbm [thread:$0]  %s175_s7, 16, %s381_s3, [#allocation5]  }
  0x7c   :  { %s248_s21 = scalar_lea.vmem %s346_s9, 16  ;;  %s252_s22 = scalar_lea.vmem %s346_s9, 32 }
  0x7d   :  { %p249_p8 = scmp.ne.s32.totalorder %s346_s9, %s248_s21  ;;  %p253_p9 = scmp.lt.s32.totalorder %s346_s9, %s346_s9 }
  0x7e   :  { %p254_p10 = scmp.lt.s32.totalorder %s252_s22, %s248_s21 }
  0x80   :  { %p255_p11 = por %p254_p10, %p253_p9 }
  0x82   :  { %p256_p12 = pnand %p255_p11, %p249_p8 }
  0x84   :  { %259 = shalt.err (!%p256_p12)
}
  0x85   :  { %s260_s25 = scalar_lea.hbm %s382_s4, 16 }
  0x86   :  { %p261_p13 = scmp.ne.s32.totalorder %s382_s4, %s260_s25  ;;  %p264_p0 = scmp.lt.u32.totalorder %s260_s25, %s382_s4 }
  0x88   :  { %p266_p1 = pnand %p264_p0, %p261_p13 }
  0x8a   :  { %269 = shalt.err (!%p266_p1)
}
  0x8b   :  { %187 = dma.vmem_to_hbm [thread:$0]  %s346_s9, 16, %s382_s4, [#allocation7]  }
  0x8c   :  { %270 = dma.done.wait [#allocation5], 16  }
  0x8d   :  { %271 = vsyncadd [#allocation5], 4294967280 }
  0x8e   :  { %272 = dma.done.wait [#allocation7], 16  }
  0x8f   :  { %273 = vsyncadd [#allocation7], 4294967280 }
  0x90   :  { %194 = vsyncpa [#allocation5], 1 }
  0x91   :  { %195 = vsyncpa [#allocation7], 1 }

</bundles_post_ra>
